<compile_context>
chip_gen: v7x
topology: tpu7x:2x2x1
jax: 0.10.0
libtpu: 0.0.40
codegen_flags: <defaults>
</compile_context>

<pallas_src>
import functools

import jax
import jax.numpy as jnp
from jax.experimental import pallas as pl
from jax.experimental.pallas import tpu as pltpu

LANE = 128


def _round_up(x, m):
    return ((x + m - 1) // m) * m


def mlp_kernel(x_ref, w1t_ref, b1_ref, w2t_ref, b2_ref, o_ref, *,
               use_vpu_l1, use_vpu_l2):
    x = x_ref[...]        # [f, tm]   batch in lanes
    w1t = w1t_ref[...]    # [h, f]    resident
    b1 = b1_ref[...]      # [h, 1]    resident
    w2t = w2t_ref[...]    # [o, h]    resident
    b2 = b2_ref[...]      # [o, 1]    resident

    f = x.shape[0]
    h = w1t.shape[0]

    # ---- Layer 1: acc = W1 @ x + b1  -> [h, tm] ----------------------------
    if use_vpu_l1:
        # Tiny contraction dim: outer-product MACs on the VPU (lane-broadcast of the
        # W1^T column x sublane-broadcast of the x row), bias as accumulator init.
        acc = b1 + w1t[:, 0:1] * x[0:1, :]
        for j in range(1, f):
            acc = acc + w1t[:, j:j + 1] * x[j:j + 1, :]
    else:
        acc = jnp.dot(w1t, x, preferred_element_type=jnp.float32) + b1

    hact = jnp.maximum(acc, 0.0)      # ReLU, [h, tm]

    # ---- Layer 2: out = W2 @ hact + b2  -> [o, tm] --------------------------
    if use_vpu_l2:
        out = b2 + w2t[:, 0:1] * hact[0:1, :]
        for j in range(1, h):
            out = out + w2t[:, j:j + 1] * hact[j:j + 1, :]
    else:
        out = jnp.dot(w2t, hact, preferred_element_type=jnp.float32) + b2

    o_ref[...] = out.astype(o_ref.dtype)


def prepare_params(w1, b1, w2, b2):
    """One-time weight prep (hoisted out of the per-call path).

    Inputs are stored [in, out] (i.e. torch W.T); the kernel wants [out, in]
    with the batch in lanes, plus biases as [out, 1] columns.
    """
    return dict(
        w1t=jnp.asarray(w1, jnp.float32).T,           # [h, f]
        b1c=jnp.asarray(b1, jnp.float32)[:, None],    # [h, 1]
        w2t=jnp.asarray(w2, jnp.float32).T,           # [o, h]
        b2c=jnp.asarray(b2, jnp.float32)[:, None],    # [o, 1]
    )


def net_forward(x, params, *, tm=2048):
    """ReLU(x @ w1 + b1) @ w2 + b2 with x: [n, f] -> [n, o]."""
    n, f = x.shape
    h, f2 = params["w1t"].shape
    o = params["w2t"].shape[0]
    assert f == f2

    # Lane tile over the batch (multiple of 128), capped so tiny demos use one tile.
    tm = max(LANE, min(_round_up(tm, LANE), _round_up(n, LANE)))
    n_pad = _round_up(n, tm)

    # Layout plumbing only: present x batch-in-lanes (lane-dense tiles); the pad is
    # on a [f, n] array (f tiny) so it is negligible and fuses with the transpose.
    x_t = jnp.asarray(x, jnp.float32).T               # [f, n]
    if n_pad != n:
        x_t = jnp.pad(x_t, ((0, 0), (0, n_pad - n)))

    kernel = functools.partial(mlp_kernel,
                               use_vpu_l1=(f <= 8),
                               use_vpu_l2=(h <= 32))

    flops = 2 * n_pad * (f * h + h * o) + n_pad * (h + o)
    bytes_accessed = 4 * (f * n_pad + o * n_pad + h * f + h + o * h + o)

    out_t = pl.pallas_call(
        kernel,
        out_shape=jax.ShapeDtypeStruct((o, n_pad), jnp.float32),
        grid_spec=pltpu.PrefetchScalarGridSpec(
            num_scalar_prefetch=0,
            grid=(n_pad // tm,),
            in_specs=[
                pl.BlockSpec((f, tm), lambda i: (0, i)),   # x tile (streams over batch)
                pl.BlockSpec((h, f), lambda i: (0, 0)),    # W1^T (VMEM resident)
                pl.BlockSpec((h, 1), lambda i: (0, 0)),    # b1   (VMEM resident)
                pl.BlockSpec((o, h), lambda i: (0, 0)),    # W2^T (VMEM resident)
                pl.BlockSpec((o, 1), lambda i: (0, 0)),    # b2   (VMEM resident)
            ],
            out_specs=pl.BlockSpec((o, tm), lambda i: (0, i)),
        ),
        compiler_params=pltpu.CompilerParams(
            dimension_semantics=("parallel",)),
        cost_estimate=pl.CostEstimate(flops=flops, transcendentals=0,
                                      bytes_accessed=bytes_accessed),
    )(x_t, params["w1t"], params["b1c"], params["w2t"], params["b2c"])

    # o (=2) rows only: the slice/transpose back to [n, o] is negligible traffic.
    return out_t[:, :n].T


def init_params(key, n_features, n_hidden, n_output):
    # Deterministic init mimicking torch.nn.Linear's uniform(-1/sqrt(fan_in), 1/sqrt(fan_in)).
    k1, k2, k3, k4 = jax.random.split(key, 4)
    bound1 = 1.0 / jnp.sqrt(n_features)
    bound2 = 1.0 / jnp.sqrt(n_hidden)
    w1 = jax.random.uniform(k1, (n_features, n_hidden), jnp.float32, -bound1, bound1)
    b1 = jax.random.uniform(k2, (n_hidden,), jnp.float32, -bound1, bound1)
    w2 = jax.random.uniform(k3, (n_hidden, n_output), jnp.float32, -bound2, bound2)
    b2 = jax.random.uniform(k4, (n_output,), jnp.float32, -bound2, bound2)
    return w1, b1, w2, b2


if __name__ == "__main__":
    key = jax.random.PRNGKey(0)
    kx0, kx1, kp = jax.random.split(key, 3)

    # Mirror the script's synthetic 2-class data (two Gaussian blobs), small sizes.
    n_per_class, n_features, n_hidden, n_output = 8, 2, 10, 2
    x0 = 2.0 + jax.random.normal(kx0, (n_per_class, n_features), jnp.float32)
    x1 = -2.0 + jax.random.normal(kx1, (n_per_class, n_features), jnp.float32)
    x = jnp.concatenate([x0, x1], axis=0)  # [16, 2] float32

    w1, b1, w2, b2 = init_params(kp, n_features, n_hidden, n_output)
    params = prepare_params(w1, b1, w2, b2)   # hoisted one-time prep

    out = net_forward(x, params)
    out = jax.block_until_ready(out)

    # Pure-JAX reference check.
    ref = jnp.maximum(x @ w1 + b1, 0.0) @ w2 + b2
    assert out.shape == (2 * n_per_class, n_output)
    assert jnp.allclose(out, ref, atol=1e-4, rtol=1e-4), "mismatch vs reference"

    print("KERNEL_OK")
</pallas_src>

<mosaic_0001>
module attributes {stable_mosaic.version = 11 : i64} {
  func.func @mlp_kernel(%arg0: i32, %arg1: memref<2x128xf32, #tpu.memory_space<vmem>>, %arg2: memref<10x2xf32, #tpu.memory_space<vmem>>, %arg3: memref<10x1xf32, #tpu.memory_space<vmem>>, %arg4: memref<2x10xf32, #tpu.memory_space<vmem>>, %arg5: memref<2x1xf32, #tpu.memory_space<vmem>>, %arg6: memref<2x128xf32, #tpu.memory_space<vmem>>) attributes {dimension_semantics = [#tpu.dimension_semantics<parallel>], iteration_bounds = array<i64: 1>, scalar_prefetch = 0 : i64, scratch_operands = 0 : i64, tpu.core_type = #tpu.core_type<tc>, window_params = [{transform_indices = @transform_0, window_bounds = array<i64: 2, 128>}, {pipeline_mode = #tpu.pipeline_mode<synchronous>, transform_indices = @transform_1, window_bounds = array<i64: 10, 2>}, {pipeline_mode = #tpu.pipeline_mode<synchronous>, transform_indices = @transform_2, window_bounds = array<i64: 10, 1>}, {pipeline_mode = #tpu.pipeline_mode<synchronous>, transform_indices = @transform_3, window_bounds = array<i64: 2, 10>}, {pipeline_mode = #tpu.pipeline_mode<synchronous>, transform_indices = @transform_4, window_bounds = array<i64: 2, 1>}, {transform_indices = @transform_5, window_bounds = array<i64: 2, 128>}]} {
    %c0 = arith.constant 0 : index
    %c0_0 = arith.constant 0 : index
    %0 = vector.load %arg1[%c0, %c0_0] : memref<2x128xf32, #tpu.memory_space<vmem>>, vector<2x128xf32>
    %c0_1 = arith.constant 0 : index
    %c0_2 = arith.constant 0 : index
    %1 = vector.load %arg2[%c0_1, %c0_2] : memref<10x2xf32, #tpu.memory_space<vmem>>, vector<10x2xf32>
    %c0_3 = arith.constant 0 : index
    %c0_4 = arith.constant 0 : index
    %2 = vector.load %arg3[%c0_3, %c0_4] : memref<10x1xf32, #tpu.memory_space<vmem>>, vector<10x1xf32>
    %c0_5 = arith.constant 0 : index
    %c0_6 = arith.constant 0 : index
    %3 = vector.load %arg4[%c0_5, %c0_6] : memref<2x10xf32, #tpu.memory_space<vmem>>, vector<2x10xf32>
    %c0_7 = arith.constant 0 : index
    %c0_8 = arith.constant 0 : index
    %4 = vector.load %arg5[%c0_7, %c0_8] : memref<2x1xf32, #tpu.memory_space<vmem>>, vector<2x1xf32>
    %5 = vector.extract_strided_slice %1 {offsets = [0, 0], sizes = [10, 1], strides = [1, 1]} : vector<10x2xf32> to vector<10x1xf32>
    %6 = vector.extract_strided_slice %0 {offsets = [0, 0], sizes = [1, 128], strides = [1, 1]} : vector<2x128xf32> to vector<1x128xf32>
    %7 = vector.broadcast %5 : vector<10x1xf32> to vector<10x128xf32>
    %8 = vector.broadcast %6 : vector<1x128xf32> to vector<10x128xf32>
    %9 = arith.mulf %7, %8 : vector<10x128xf32>
    %10 = vector.broadcast %2 : vector<10x1xf32> to vector<10x128xf32>
    %11 = arith.addf %10, %9 : vector<10x128xf32>
    %12 = vector.extract_strided_slice %1 {offsets = [0, 1], sizes = [10, 1], strides = [1, 1]} : vector<10x2xf32> to vector<10x1xf32>
    %13 = vector.extract_strided_slice %0 {offsets = [1, 0], sizes = [1, 128], strides = [1, 1]} : vector<2x128xf32> to vector<1x128xf32>
    %14 = vector.broadcast %12 : vector<10x1xf32> to vector<10x128xf32>
    %15 = vector.broadcast %13 : vector<1x128xf32> to vector<10x128xf32>
    %16 = arith.mulf %14, %15 : vector<10x128xf32>
    %17 = arith.addf %11, %16 : vector<10x128xf32>
    %cst = arith.constant 0.000000e+00 : f32
    %18 = vector.broadcast %cst : f32 to vector<10x128xf32>
    %19 = arith.maximumf %17, %18 : vector<10x128xf32>
    %20 = vector.extract_strided_slice %3 {offsets = [0, 0], sizes = [2, 1], strides = [1, 1]} : vector<2x10xf32> to vector<2x1xf32>
    %21 = vector.extract_strided_slice %19 {offsets = [0, 0], sizes = [1, 128], strides = [1, 1]} : vector<10x128xf32> to vector<1x128xf32>
    %22 = vector.broadcast %20 : vector<2x1xf32> to vector<2x128xf32>
    %23 = vector.broadcast %21 : vector<1x128xf32> to vector<2x128xf32>
    %24 = arith.mulf %22, %23 : vector<2x128xf32>
    %25 = vector.broadcast %4 : vector<2x1xf32> to vector<2x128xf32>
    %26 = arith.addf %25, %24 : vector<2x128xf32>
    %27 = vector.extract_strided_slice %3 {offsets = [0, 1], sizes = [2, 1], strides = [1, 1]} : vector<2x10xf32> to vector<2x1xf32>
    %28 = vector.extract_strided_slice %19 {offsets = [1, 0], sizes = [1, 128], strides = [1, 1]} : vector<10x128xf32> to vector<1x128xf32>
    %29 = vector.broadcast %27 : vector<2x1xf32> to vector<2x128xf32>
    %30 = vector.broadcast %28 : vector<1x128xf32> to vector<2x128xf32>
    %31 = arith.mulf %29, %30 : vector<2x128xf32>
    %32 = arith.addf %26, %31 : vector<2x128xf32>
    %33 = vector.extract_strided_slice %3 {offsets = [0, 2], sizes = [2, 1], strides = [1, 1]} : vector<2x10xf32> to vector<2x1xf32>
    %34 = vector.extract_strided_slice %19 {offsets = [2, 0], sizes = [1, 128], strides = [1, 1]} : vector<10x128xf32> to vector<1x128xf32>
    %35 = vector.broadcast %33 : vector<2x1xf32> to vector<2x128xf32>
    %36 = vector.broadcast %34 : vector<1x128xf32> to vector<2x128xf32>
    %37 = arith.mulf %35, %36 : vector<2x128xf32>
    %38 = arith.addf %32, %37 : vector<2x128xf32>
    %39 = vector.extract_strided_slice %3 {offsets = [0, 3], sizes = [2, 1], strides = [1, 1]} : vector<2x10xf32> to vector<2x1xf32>
    %40 = vector.extract_strided_slice %19 {offsets = [3, 0], sizes = [1, 128], strides = [1, 1]} : vector<10x128xf32> to vector<1x128xf32>
    %41 = vector.broadcast %39 : vector<2x1xf32> to vector<2x128xf32>
    %42 = vector.broadcast %40 : vector<1x128xf32> to vector<2x128xf32>
    %43 = arith.mulf %41, %42 : vector<2x128xf32>
    %44 = arith.addf %38, %43 : vector<2x128xf32>
    %45 = vector.extract_strided_slice %3 {offsets = [0, 4], sizes = [2, 1], strides = [1, 1]} : vector<2x10xf32> to vector<2x1xf32>
    %46 = vector.extract_strided_slice %19 {offsets = [4, 0], sizes = [1, 128], strides = [1, 1]} : vector<10x128xf32> to vector<1x128xf32>
    %47 = vector.broadcast %45 : vector<2x1xf32> to vector<2x128xf32>
    %48 = vector.broadcast %46 : vector<1x128xf32> to vector<2x128xf32>
    %49 = arith.mulf %47, %48 : vector<2x128xf32>
    %50 = arith.addf %44, %49 : vector<2x128xf32>
    %51 = vector.extract_strided_slice %3 {offsets = [0, 5], sizes = [2, 1], strides = [1, 1]} : vector<2x10xf32> to vector<2x1xf32>
    %52 = vector.extract_strided_slice %19 {offsets = [5, 0], sizes = [1, 128], strides = [1, 1]} : vector<10x128xf32> to vector<1x128xf32>
    %53 = vector.broadcast %51 : vector<2x1xf32> to vector<2x128xf32>
    %54 = vector.broadcast %52 : vector<1x128xf32> to vector<2x128xf32>
    %55 = arith.mulf %53, %54 : vector<2x128xf32>
    %56 = arith.addf %50, %55 : vector<2x128xf32>
    %57 = vector.extract_strided_slice %3 {offsets = [0, 6], sizes = [2, 1], strides = [1, 1]} : vector<2x10xf32> to vector<2x1xf32>
    %58 = vector.extract_strided_slice %19 {offsets = [6, 0], sizes = [1, 128], strides = [1, 1]} : vector<10x128xf32> to vector<1x128xf32>
    %59 = vector.broadcast %57 : vector<2x1xf32> to vector<2x128xf32>
    %60 = vector.broadcast %58 : vector<1x128xf32> to vector<2x128xf32>
    %61 = arith.mulf %59, %60 : vector<2x128xf32>
    %62 = arith.addf %56, %61 : vector<2x128xf32>
    %63 = vector.extract_strided_slice %3 {offsets = [0, 7], sizes = [2, 1], strides = [1, 1]} : vector<2x10xf32> to vector<2x1xf32>
    %64 = vector.extract_strided_slice %19 {offsets = [7, 0], sizes = [1, 128], strides = [1, 1]} : vector<10x128xf32> to vector<1x128xf32>
    %65 = vector.broadcast %63 : vector<2x1xf32> to vector<2x128xf32>
    %66 = vector.broadcast %64 : vector<1x128xf32> to vector<2x128xf32>
    %67 = arith.mulf %65, %66 : vector<2x128xf32>
    %68 = arith.addf %62, %67 : vector<2x128xf32>
    %69 = vector.extract_strided_slice %3 {offsets = [0, 8], sizes = [2, 1], strides = [1, 1]} : vector<2x10xf32> to vector<2x1xf32>
    %70 = vector.extract_strided_slice %19 {offsets = [8, 0], sizes = [1, 128], strides = [1, 1]} : vector<10x128xf32> to vector<1x128xf32>
    %71 = vector.broadcast %69 : vector<2x1xf32> to vector<2x128xf32>
    %72 = vector.broadcast %70 : vector<1x128xf32> to vector<2x128xf32>
    %73 = arith.mulf %71, %72 : vector<2x128xf32>
    %74 = arith.addf %68, %73 : vector<2x128xf32>
    %75 = vector.extract_strided_slice %3 {offsets = [0, 9], sizes = [2, 1], strides = [1, 1]} : vector<2x10xf32> to vector<2x1xf32>
    %76 = vector.extract_strided_slice %19 {offsets = [9, 0], sizes = [1, 128], strides = [1, 1]} : vector<10x128xf32> to vector<1x128xf32>
    %77 = vector.broadcast %75 : vector<2x1xf32> to vector<2x128xf32>
    %78 = vector.broadcast %76 : vector<1x128xf32> to vector<2x128xf32>
    %79 = arith.mulf %77, %78 : vector<2x128xf32>
    %80 = arith.addf %74, %79 : vector<2x128xf32>
    %c0_9 = arith.constant 0 : index
    %c0_10 = arith.constant 0 : index
    %81 = vector.load %arg6[%c0_9, %c0_10] : memref<2x128xf32, #tpu.memory_space<vmem>>, vector<2x128xf32>
    tpu.vector_store %arg6[%c0_9, %c0_10], %80 {strides = array<i32>} : memref<2x128xf32, #tpu.memory_space<vmem>>, vector<2x128xf32>,
    return
  }
  func.func @transform_0(%arg0: i32) -> (i32, i32) {
    %c0_i32 = arith.constant 0 : i32
    %c0_i32_0 = arith.constant 0 : i32
    return %c0_i32, %arg0 : i32, i32
  }
  func.func @transform_1(%arg0: i32) -> (i32, i32) {
    %c0_i32 = arith.constant 0 : i32
    %c0_i32_0 = arith.constant 0 : i32
    %c0_i32_1 = arith.constant 0 : i32
    return %c0_i32, %c0_i32_0 : i32, i32
  }
  func.func @transform_2(%arg0: i32) -> (i32, i32) {
    %c0_i32 = arith.constant 0 : i32
    %c0_i32_0 = arith.constant 0 : i32
    %c0_i32_1 = arith.constant 0 : i32
    return %c0_i32, %c0_i32_0 : i32, i32
  }
  func.func @transform_3(%arg0: i32) -> (i32, i32) {
    %c0_i32 = arith.constant 0 : i32
    %c0_i32_0 = arith.constant 0 : i32
    %c0_i32_1 = arith.constant 0 : i32
    return %c0_i32, %c0_i32_0 : i32, i32
  }
  func.func @transform_4(%arg0: i32) -> (i32, i32) {
    %c0_i32 = arith.constant 0 : i32
    %c0_i32_0 = arith.constant 0 : i32
    %c0_i32_1 = arith.constant 0 : i32
    return %c0_i32, %c0_i32_0 : i32, i32
  }
  func.func @transform_5(%arg0: i32) -> (i32, i32) {
    %c0_i32 = arith.constant 0 : i32
    %c0_i32_0 = arith.constant 0 : i32
    return %c0_i32, %arg0 : i32, i32
  }
}

</mosaic_0001>

<bundles_post_ra>
// kernel: tpu_custom_call.1
= control target key start
LH: loop header
LB: loop body
LE: loop exit
PB: predicated region body
PF: predicated region fallthrough
CT: control target
= control target key end

     0   :  { %v245_v2 = vmov 2   ;;  %v246_v3 = vmov 1   ;;  %s319_s0 = inlined_call_operand.vmem [shape: f32[2,128], index: 0, kind: input, shape index: {}]   ;;  %s320_s1 = inlined_call_operand.vmem [shape: f32[10,2], index: 1, kind: input, shape index: {}]   ;;  %s321_s2 = inlined_call_operand.vmem [shape: f32[10,1], index: 2, kind: input, shape index: {}]   ;;  %s322_s3 = inlined_call_operand.vmem [shape: f32[2,10], index: 3, kind: input, shape index: {}]   ;;  %s323_s4 = inlined_call_operand.vmem [shape: f32[2,1], index: 4, kind: input, shape index: {}]   ;;  %s324_s5 = inlined_call_operand.hbm [shape: f32[2,128], index: 5, kind: output, shape index: {}]  }
   0x1   :  { %v26_v0 = vld [vmem:[%s322_s3] sm:$0x3]  ;;  %209 = vset.pattern.permute.xlu0 %v245_v2  ;;  %206 = vset.pattern.permute.xlu1 %v246_v3 }
   0x2   :  { %v22_v1 = vld [vmem:[%s320_s1] sm:$0xff]  ;;  %101 = vperm.xlu0 %209, %v26_v0  }
   0x3   :  { %57 = vperm.xlu1 %206, %v22_v1  }
   0x4   :  { %10 = vsyncpa [#allocation3], 0  ;;  %v247_v4 = vmov 0   ;;  %v24_v5 = vld [vmem:[%s321_s2] sm:$0xff]  ;;  %v23_v7 = vld [vmem:[%s320_s1 + $0x8] sm:$0x3]  ;;  %v38_v16 = vlaneseq }
   0x5   :  { %v27_v6 = vld [vmem:[%s323_s4] sm:$0x3]  ;;  %v25_v8 = vld [vmem:[%s321_s2 + $0x8] sm:$0x3]  ;;  %v248_v9 = vmov 3   ;;  %v249_v10 = vmov 5  }
   0x6   :  { %210 = vset.pattern.permute.xlu0 %v247_v4  ;;  %v250_v11 = vmov 8   ;;  %v251_v12 = vmov 4   ;;  %v252_v13 = vmov 9   ;;  %v253_v14 = vmov 6   ;;  %v21_v21 = vld [vmem:[%s319_s0] sm:$0x3] }
   0x7   :  { %207 = vset.pattern.permute.xlu1 %v247_v4  ;;  %30 = vperm.xlu0 %210, %v22_v1   ;;  %v254_v15 = vmov 7   ;;  %v39_v17 = vshrl.u32 %v38_v16, 7  ;;  %s255_s0 = smov [#allocation2]  }
   0x8   :  { %76 = vperm.xlu1 %207, %v26_v0   ;;  %s187_s4 = sshll.u32 %s255_s0, 4  ;;  %s188_s4 = int_to_ptr.vmem [resolvable:$true] %s187_s4 }
   0x9   :  { %v40_v18 = vsub.s32 0, %v39_v17  ;;  %v66_v22 = vsub.s32 1, %v39_v17  ;;  %v106_v37 = vsub.s32 2, %v39_v17  ;;  %v116_v45 = vsub.s32 3, %v39_v17  ;;  %s221_s29 = scalar_lea.vmem %s188_s4, 32  ;;  %p226_p1 = scmp.lt.s32.totalorder %s188_s4, %s188_s4 }
   0xa   :  { %v126_v49 = vsub.s32 4, %v39_v17  ;;  %v136_v56 = vsub.s32 5, %v39_v17  ;;  %v146_v62 = vsub.s32 6, %v39_v17  ;;  %p222_p0 = scmp.ne.s32.totalorder %s188_s4, %s221_s29  ;;  %p227_p2 = scmp.lt.s32.totalorder %s221_s29, %s221_s29 }
   0xb   :  { %46 = vperm.xlu0 %210, %v24_v5   ;;  %v41_v23 = vrot.slane %v21_v21, %v40_v18  ;;  %v67_v26 = vrot.slane %v21_v21, %v66_v22 }
   0xc   :  { %208 = vset.pattern.permute.xlu1 %v246_v3  ;;  %p228_p3 = por %p227_p2, %p226_p1 }
   0xd   :  { %91 = vperm.xlu1 %208, %v26_v0  }
   0xe   :  { %p229_p4 = pnand %p228_p3, %p222_p0 }
   0xf   :  { %86 = vperm.xlu0 %210, %v27_v6   ;;  %v156_v6 = vsub.s32 7, %v39_v17 }
  0x11   :  { %211 = vset.pattern.permute.xlu1 %v247_v4 }
  0x12   :  { %35 = vperm.xlu1 %211, %v23_v7  }
  0x13   :  { %51 = vperm.xlu0 %210, %v25_v8  }
  0x16   :  { %212 = vset.pattern.permute.xlu1 %v248_v9 }
  0x17   :  { %111 = vperm.xlu1 %212, %v26_v0   ;;  %215 = vset.pattern.permute.xlu0 %v249_v10 }
  0x18   :  { %131 = vperm.xlu0 %215, %v26_v0  }
  0x1b   :  { %213 = vset.pattern.permute.xlu1 %v246_v3 }
  0x1c   :  { %61 = vperm.xlu1 %213, %v23_v7   ;;  %218 = vset.pattern.permute.xlu0 %v250_v11 }
  0x1d   :  { %161 = vperm.xlu0 %218, %v26_v0  }
  0x20   :  { %214 = vset.pattern.permute.xlu1 %v251_v12 }
  0x21   :  { %121 = vperm.xlu1 %214, %v26_v0   ;;  %220 = vset.pattern.permute.xlu0 %v252_v13 }
  0x25   :  { %216 = vset.pattern.permute.xlu1 %v253_v14 }
  0x26   :  { %141 = vperm.xlu1 %216, %v26_v0  }
  0x2a   :  { %217 = vset.pattern.permute.xlu1 %v254_v15 }
  0x2b   :  { %151 = vperm.xlu1 %217, %v26_v0  }
  0x2f   :  { %219 = vset.pattern.permute.xlu1 %v252_v13 }
  0x30   :  { %171 = vperm.xlu1 %219, %v26_v0  }
  0x81   :  { %v102_v20 = vpop.permute.xlu0 %101 }
  0x82   :  { %v58_v19 = vpop.permute.xlu1 %57 }
  0x83   :  { %v68_v29 = vmul.f32 %v67_v26, %v58_v19 }
  0x86   :  { %v31_v24 = vpop.permute.xlu0 %30 }
  0x87   :  { %v77_v25 = vpop.permute.xlu1 %76  ;;  %v42_v27 = vmul.f32 %v41_v23, %v31_v24 }
  0x8a   :  { %v47_v28 = vpop.permute.xlu0 %46 }
  0x8b   :  { %v54_v30 = vadd.f32 %v47_v28, %v42_v27 }
  0x8c   :  { %v92_v31 = vpop.permute.xlu1 %91 }
  0x8d   :  { %v70_v32 = vadd.f32 %v68_v29, %v54_v30 }
  0x8e   :  { %v87_v39 = vpop.permute.xlu0 %86 }
  0x8f   :  { %v72_v33 = vmax.f32 %v70_v32, 0.0 }
  0x91   :  { %v36_v34 = vpop.permute.xlu1 %35  ;;  %v82_v35 = vrot.slane %v72_v33, %v40_v18  ;;  %v97_v36 = vrot.slane %v72_v33, %v66_v22  ;;  %v107_v43 = vrot.slane %v72_v33, %v106_v37  ;;  %v117_v52 = vrot.slane %v72_v33, %v116_v45 }
  0x92   :  { %v43_v46 = vmul.f32 %v41_v23, %v36_v34  ;;  %v52_v50 = vpop.permute.xlu0 %51  ;;  %v127_v57 = vrot.slane %v72_v33, %v126_v49  ;;  %v137_v0 = vrot.slane %v72_v33, %v136_v56  ;;  %v147_v5 = vrot.slane %v72_v33, %v146_v62 }
  0x93   :  { %v83_v38 = vmul.f32 %v82_v35, %v77_v25  ;;  %v98_v42 = vmul.f32 %v97_v36, %v92_v31  ;;  %v108_v47 = vmul.f32 %v107_v43, %v102_v20  ;;  %v157_v10 = vrot.slane %v72_v33, %v156_v6 }
  0x94   :  { %v55_v54 = vadd.f32 %v52_v50, %v43_v46 }
  0x95   :  { %v89_v40 = vadd.f32 %v87_v39, %v83_v38 }
  0x96   :  { %v112_v41 = vpop.permute.xlu1 %111 }
  0x97   :  { %v99_v44 = vadd.f32 %v98_v42, %v89_v40  ;;  %v118_v55 = vmul.f32 %v117_v52, %v112_v41  ;;  %v132_v63 = vpop.permute.xlu0 %131 }
  0x98   :  { %v138_v2 = vmul.f32 %v137_v0, %v132_v63 }
  0x99   :  { %v109_v51 = vadd.f32 %v108_v47, %v99_v44 }
  0x9b   :  { %v62_v48 = vpop.permute.xlu1 %61  ;;  %v119_v59 = vadd.f32 %v118_v55, %v109_v51 }
  0x9c   :  { %v69_v53 = vmul.f32 %v67_v26, %v62_v48  ;;  %v162_v11 = vpop.permute.xlu0 %161 }
  0x9e   :  { %v71_v60 = vadd.f32 %v69_v53, %v55_v54 }
  0xa0   :  { %v122_v58 = vpop.permute.xlu1 %121  ;;  %v73_v3 = vmax.f32 %v71_v60, 0.0 }
  0xa1   :  { %v128_v61 = vmul.f32 %v127_v57, %v122_v58 }
  0xa2   :  { %v167_v9 = vrot.slane %v73_v3, %v40_v18  ;;  %v177_v19 = vrot.slane %v73_v3, %v66_v22 }
  0xa3   :  { %v129_v1 = vadd.f32 %v128_v61, %v119_v59 }
  0xa4   :  { %v168_v15 = vmul.f32 %v167_v9, %v162_v11 }
  0xa5   :  { %v142_v4 = vpop.permute.xlu1 %141  ;;  %v139_v7 = vadd.f32 %v138_v2, %v129_v1 }
  0xa6   :  { %v148_v8 = vmul.f32 %v147_v5, %v142_v4 }
  0xa8   :  { %v149_v13 = vadd.f32 %v148_v8, %v139_v7 }
  0xaa   :  { %v152_v12 = vpop.permute.xlu1 %151 }
  0xab   :  { %v158_v14 = vmul.f32 %v157_v10, %v152_v12 }
  0xad   :  { %v159_v16 = vadd.f32 %v158_v14, %v149_v13 }
  0xaf   :  { %v172_v20 = vpop.permute.xlu1 %171  ;;  %v169_v21 = vadd.f32 %v168_v15, %v159_v16 }
  0xb0   :  { %v178_v23 = vmul.f32 %v177_v19, %v172_v20 }
  0xb2   :  { %v179_v24 = vadd.f32 %v178_v23, %v169_v21 }
  0xb4   :  { %180 = vst [vmem:[#allocation2] sm:$0x3] %v179_v24 }
  0xb5   :  { %232 = shalt.err (!%p229_p4)
}
  0xb6   :  { %s233_s7 = scalar_lea.hbm %s324_s5, 32 }
  0xb7   :  { %p234_p5 = scmp.ne.s32.totalorder %s324_s5, %s233_s7  ;;  %p237_p6 = scmp.lt.u32.totalorder %s233_s7, %s324_s5 }
  0xb9   :  { %p239_p7 = pnand %p237_p6, %p234_p5 }
  0xbb   :  { %242 = shalt.err (!%p239_p7)
}
  0xbc   :  { %190 = dma.vmem_to_hbm [thread:$0]  %s188_s4, 32, %s324_s5, [#allocation3]  }
  0xbd   :  { %243 = dma.done.wait [#allocation3], 32  }
  0xbe   :  { %244 = vsyncadd [#allocation3], 4294967264 }
  0xbf   :  { %194 = vsyncpa [#allocation3], 1 }

</bundles_post_ra>
